<compile_context>
chip_gen: v6e
topology: v6e:2x2x1
jax: 0.10.0
libtpu: 0.0.40
codegen_flags: <defaults>
</compile_context>

<pallas_src>
import functools

import jax
import jax.numpy as jnp
from jax.experimental import pallas as pl
from jax.experimental.pallas import tpu as pltpu


def _round_up(x: int, m: int) -> int:
    return ((x + m - 1) // m) * m


def _vmem_limit_bytes() -> int:
    """Derive a per-chip scoped-VMEM budget (leave ~1/4 headroom)."""
    try:
        cap = getattr(pltpu.get_tpu_info(), "vmem_capacity_bytes",
                      64 * 1024 * 1024)
    except Exception:  # no TPU info available at trace time -> conservative
        cap = 64 * 1024 * 1024
    return int(cap * 3 // 4)


def _mlp_head_kernel(x_ref, w1_ref, bias_ref, w2_ref, o_ref):
    # Cast activations to bf16 in-kernel (VPU work hidden under MXU) rather
    # than a separate host-side XLA cast pass over x.
    x = x_ref[...].astype(jnp.bfloat16)
    # fc1 with BN scale pre-folded: [TB, dim] @ [dim, h_pad] -> f32 [TB, h_pad]
    h = jnp.dot(x, w1_ref[...], preferred_element_type=jnp.float32)
    # BatchNorm1d (eval) residual bias, broadcast over batch rows.
    h = h + bias_ref[...]
    # ReLU (Act with act_type='relu').
    h = jnp.maximum(h, 0.0)
    # Dropout: identity in eval mode.
    # fc2: [TB, h_pad] @ [h_pad, n_pad] -> [TB, n_pad]
    out = jnp.dot(h.astype(jnp.bfloat16), w2_ref[...],
                  preferred_element_type=jnp.float32)
    o_ref[...] = out.astype(o_ref.dtype)


def prepare_mlp_head_weights(w1, w2, gamma, beta, running_mean, running_var,
                             eps=1e-5):
    """One-time weight preparation (call once, NOT per forward pass).

    w1: [hidden, dim]          fc1 weight (PyTorch [out, in] layout)
    w2: [num_classes, hidden]  fc2 weight (PyTorch [out, in] layout)
    gamma/beta/running_mean/running_var: [hidden] BatchNorm1d params/stats.

    Returns:
      w1p  [dim,  h_pad] bf16  — fc1 weight with BN scale folded, transposed
      bias [1,    h_pad] f32   — BN residual bias (beta - mean*scale)
      w2p  [h_pad, n_pad] bf16 — fc2 weight, transposed, lane-padded
    """
    hidden, _ = w1.shape
    num_classes = w2.shape[0]

    scale = gamma.astype(jnp.float32) / jnp.sqrt(
        running_var.astype(jnp.float32) + eps)
    bias = (beta.astype(jnp.float32)
            - running_mean.astype(jnp.float32) * scale).reshape(1, hidden)

    # Fold BN scale into fc1 (fc1 has no bias) and transpose to [dim, hidden].
    w1p = (w1.astype(jnp.float32).T * scale[None, :]).astype(jnp.bfloat16)
    w2p = w2.astype(jnp.bfloat16).T  # [hidden, num_classes]

    # Lane-pad hidden and num_classes to multiples of 128 (zero padding is
    # exact: padded h columns are 0, ReLU(0)=0, padded w2 rows contribute 0).
    h_pad = _round_up(hidden, 128)
    n_pad = _round_up(num_classes, 128)
    if h_pad != hidden:
        w1p = jnp.pad(w1p, ((0, 0), (0, h_pad - hidden)))
        bias = jnp.pad(bias, ((0, 0), (0, h_pad - hidden)))
        w2p = jnp.pad(w2p, ((0, h_pad - hidden), (0, 0)))
    if n_pad != num_classes:
        w2p = jnp.pad(w2p, ((0, 0), (0, n_pad - num_classes)))
    return w1p, bias, w2p


@functools.partial(jax.jit, static_argnames=("num_classes", "tb"))
def mlp_head(x, w1p, bias, w2p, *, num_classes, tb=256):
    """MlpHead forward (eval mode) with pre-prepared weights.

    x:    [B, dim]        activations (any float dtype; cast in-kernel)
    w1p:  [dim, h_pad]    prepared fc1 weight (bf16, BN scale folded)
    bias: [1, h_pad]      BN residual bias (f32)
    w2p:  [h_pad, n_pad]  prepared fc2 weight (bf16)
    returns [B, num_classes] in x.dtype
    """
    B, dim = x.shape
    h_pad = w1p.shape[1]
    n_pad = w2p.shape[1]
    out_dtype = x.dtype

    # Batch tile: multiple of 16 sublanes (bf16 packing quantum); a single
    # grid step for small B to avoid per-step pipeline overhead and dead rows.
    tb = max(16, _round_up(int(tb), 16))
    tb = min(tb, _round_up(B, 16))
    grid = (pl.cdiv(B, tb),)  # ragged last block is clipped by Pallas

    out = pl.pallas_call(
        _mlp_head_kernel,
        out_shape=jax.ShapeDtypeStruct((B, n_pad), out_dtype),
        grid_spec=pltpu.PrefetchScalarGridSpec(
            num_scalar_prefetch=0,
            grid=grid,
            in_specs=[
                # Activations: one batch tile per grid step (pipelined).
                pl.BlockSpec((tb, dim), lambda i: (i, 0)),
                # Weights / bias: constant index_map -> DMA'd once,
                # VMEM-resident across all batch tiles.
                pl.BlockSpec((dim, h_pad), lambda i: (0, 0)),
                pl.BlockSpec((1, h_pad), lambda i: (0, 0)),
                pl.BlockSpec((h_pad, n_pad), lambda i: (0, 0)),
            ],
            out_specs=pl.BlockSpec((tb, n_pad), lambda i: (i, 0)),
        ),
        compiler_params=pltpu.CompilerParams(
            # Batch tiles are independent -> megacore/TC-shardable.
            dimension_semantics=("parallel",),
            vmem_limit_bytes=_vmem_limit_bytes(),
        ),
    )(x, w1p, bias, w2p)

    if n_pad != num_classes:
        out = out[:, :num_classes]
    return out


def mlp_head_reference(x, w1, w2, gamma, beta, running_mean, running_var, eps):
    scale = gamma / jnp.sqrt(running_var + eps)
    bias = beta - running_mean * scale
    h = x @ w1.T
    h = h * scale[None, :] + bias[None, :]
    h = jnp.maximum(h, 0.0)
    return h @ w2.T


if __name__ == "__main__":
    # Shapes consistent with the module:
    #   dim=32, mlp_ratio=4 -> hidden = min(2048, 4*32) = 128
    # B and num_classes deliberately NOT tile/lane multiples to exercise the
    # ragged-batch-block path (B=200) and lane-padding path (nc=250 -> 256).
    B, dim, mlp_ratio, num_classes = 200, 32, 4, 250
    hidden = min(2048, mlp_ratio * dim)
    eps = 1e-5

    key = jax.random.PRNGKey(0)
    kx, kw1, kw2, kg, kb, km, kv = jax.random.split(key, 7)

    x = jax.random.normal(kx, (B, dim), dtype=jnp.float32)

    # Linear weights in PyTorch [out, in] layout.
    w1 = jax.random.normal(kw1, (hidden, dim), dtype=jnp.float32) * 0.05
    w2 = jax.random.normal(kw2, (num_classes, hidden), dtype=jnp.float32) * 0.05

    # BatchNorm1d parameters / running stats (deterministic synthetic values).
    gamma = 1.0 + 0.1 * jax.random.normal(kg, (hidden,), dtype=jnp.float32)
    beta = 0.1 * jax.random.normal(kb, (hidden,), dtype=jnp.float32)
    running_mean = 0.1 * jax.random.normal(km, (hidden,), dtype=jnp.float32)
    running_var = jnp.abs(1.0 + 0.1 * jax.random.normal(
        kv, (hidden,), dtype=jnp.float32))

    # One-time weight preparation (hoisted out of the per-call path).
    w1p, bias, w2p = jax.block_until_ready(
        prepare_mlp_head_weights(w1, w2, gamma, beta, running_mean,
                                 running_var, eps))

    out = mlp_head(x, w1p, bias, w2p, num_classes=num_classes)
    out = jax.block_until_ready(out)

    ref = mlp_head_reference(x, w1, w2, gamma, beta, running_mean,
                             running_var, eps)
    assert out.shape == (B, num_classes)
    # bf16 weights/activations (f32 accumulation) -> relaxed tolerance.
    assert jnp.allclose(out, ref, atol=3e-2, rtol=3e-2), "mismatch vs reference"

    print("KERNEL_OK")
</pallas_src>

<mosaic_0001>
module attributes {stable_mosaic.version = 11 : i64} {
  func.func @_mlp_head_kernel(%arg0: i32, %arg1: memref<208x32xf32, #tpu.memory_space<vmem>>, %arg2: memref<32x128xbf16, #tpu.memory_space<vmem>>, %arg3: memref<1x128xf32, #tpu.memory_space<vmem>>, %arg4: memref<128x256xbf16, #tpu.memory_space<vmem>>, %arg5: memref<208x256xf32, #tpu.memory_space<vmem>>) attributes {dimension_semantics = [#tpu.dimension_semantics<parallel>], iteration_bounds = array<i64: 1>, scalar_prefetch = 0 : i64, scratch_operands = 0 : i64, tpu.core_type = #tpu.core_type<tc>, window_params = [{transform_indices = @transform_0, window_bounds = array<i64: 208, 32>}, {pipeline_mode = #tpu.pipeline_mode<synchronous>, transform_indices = @transform_1, window_bounds = array<i64: 32, 128>}, {pipeline_mode = #tpu.pipeline_mode<synchronous>, transform_indices = @transform_2, window_bounds = array<i64: 1, 128>}, {pipeline_mode = #tpu.pipeline_mode<synchronous>, transform_indices = @transform_3, window_bounds = array<i64: 128, 256>}, {transform_indices = @transform_4, window_bounds = array<i64: 208, 256>}]} {
    %c0 = arith.constant 0 : index
    %c0_0 = arith.constant 0 : index
    %0 = vector.load %arg1[%c0, %c0_0] : memref<208x32xf32, #tpu.memory_space<vmem>>, vector<208x32xf32>
    %1 = arith.truncf %0 : vector<208x32xf32> to vector<208x32xbf16>
    %c0_1 = arith.constant 0 : index
    %c0_2 = arith.constant 0 : index
    %2 = vector.load %arg2[%c0_1, %c0_2] : memref<32x128xbf16, #tpu.memory_space<vmem>>, vector<32x128xbf16>
    %cst = arith.constant dense<0.000000e+00> : vector<208x128xf32>
    %3 = tpu.matmul %1, %2, %cst {dimension_numbers = #tpu.dot_dimension_numbers<[1], [0], [0], [1], [0, 0, 1, 1], [], []>} : vector<208x32xbf16>, vector<32x128xbf16>, vector<208x128xf32> -> vector<208x128xf32>
    %c0_3 = arith.constant 0 : index
    %c0_4 = arith.constant 0 : index
    %4 = vector.load %arg3[%c0_3, %c0_4] : memref<1x128xf32, #tpu.memory_space<vmem>>, vector<1x128xf32>
    %5 = vector.broadcast %4 : vector<1x128xf32> to vector<208x128xf32>
    %6 = arith.addf %3, %5 : vector<208x128xf32>
    %cst_5 = arith.constant 0.000000e+00 : f32
    %7 = vector.broadcast %cst_5 : f32 to vector<208x128xf32>
    %8 = arith.maximumf %6, %7 : vector<208x128xf32>
    %9 = arith.truncf %8 : vector<208x128xf32> to vector<208x128xbf16>
    %c0_6 = arith.constant 0 : index
    %c0_7 = arith.constant 0 : index
    %10 = vector.load %arg4[%c0_6, %c0_7] : memref<128x256xbf16, #tpu.memory_space<vmem>>, vector<128x256xbf16>
    %cst_8 = arith.constant dense<0.000000e+00> : vector<208x256xf32>
    %11 = tpu.matmul %9, %10, %cst_8 {dimension_numbers = #tpu.dot_dimension_numbers<[1], [0], [0], [1], [0, 0, 1, 1], [], []>} : vector<208x128xbf16>, vector<128x256xbf16>, vector<208x256xf32> -> vector<208x256xf32>
    %c0_9 = arith.constant 0 : index
    %c0_10 = arith.constant 0 : index
    %12 = vector.load %arg5[%c0_9, %c0_10] : memref<208x256xf32, #tpu.memory_space<vmem>>, vector<208x256xf32>
    tpu.vector_store %arg5[%c0_9, %c0_10], %11 {strides = array<i32>} : memref<208x256xf32, #tpu.memory_space<vmem>>, vector<208x256xf32>,
    return
  }
  func.func @transform_0(%arg0: i32) -> (i32, i32) {
    %c0_i32 = arith.constant 0 : i32
    %c0_i32_0 = arith.constant 0 : i32
    return %arg0, %c0_i32 : i32, i32
  }
  func.func @transform_1(%arg0: i32) -> (i32, i32) {
    %c0_i32 = arith.constant 0 : i32
    %c0_i32_0 = arith.constant 0 : i32
    %c0_i32_1 = arith.constant 0 : i32
    return %c0_i32, %c0_i32_0 : i32, i32
  }
  func.func @transform_2(%arg0: i32) -> (i32, i32) {
    %c0_i32 = arith.constant 0 : i32
    %c0_i32_0 = arith.constant 0 : i32
    %c0_i32_1 = arith.constant 0 : i32
    return %c0_i32, %c0_i32_0 : i32, i32
  }
  func.func @transform_3(%arg0: i32) -> (i32, i32) {
    %c0_i32 = arith.constant 0 : i32
    %c0_i32_0 = arith.constant 0 : i32
    %c0_i32_1 = arith.constant 0 : i32
    return %c0_i32, %c0_i32_0 : i32, i32
  }
  func.func @transform_4(%arg0: i32) -> (i32, i32) {
    %c0_i32 = arith.constant 0 : i32
    %c0_i32_0 = arith.constant 0 : i32
    return %arg0, %c0_i32 : i32, i32
  }
}

</mosaic_0001>

<bundles_post_ra>
// kernel: mlp_head.1
= control target key start
LH: loop header
LB: loop body
LE: loop exit
PB: predicated region body
PF: predicated region fallthrough
CT: control target
= control target key end

     0   :  { %9 = vsyncpa [#allocation3], 0  ;;  %v797_v1 = vmov 0.0   ;;  %vm798_vm0 = vmmov 0   ;;  %vm81_vm1 = vcmask 261120   ;;  %v799_v51 = vmov 0   ;;  %s1048_s0 = inlined_call_operand.vmem [shape: f32[200,32], index: 0, kind: input, shape index: {}]   ;;  %s1049_s1 = inlined_call_operand.vmem [shape: bf16[32,128], index: 1, kind: input, shape index: {}]   ;;  %s1050_s2 = inlined_call_operand.vmem [shape: f32[1,128], index: 2, kind: input, shape index: {}]   ;;  %s1051_s3 = inlined_call_operand.vmem [shape: bf16[128,256], index: 3, kind: input, shape index: {}]   ;;  %s1052_s4 = inlined_call_operand.hbm [shape: f32[200,256], index: 4, kind: output, shape index: {}]  }
   0x1   :  { %v749_v0 = vld [vmem:[%s1049_s1 + $0x8] sm:$0xff]   ;;  %671 = vmatprep.subr.bf16.mxu0 %v797_v1  ;;  %v750_v2 = vld [vmem:[%s1049_s1] sm:$0xff]   ;;  %675 = vmatprep.mubr.msk.bf16.mxu0 %vm798_vm0, %v797_v1  ;;  %v21_v6 = vld [vmem:[%s1048_s0 + $0x10] sm:$0xff] }
   0x2   :  { %672 = vmatpush3.bf16.msra.mxu0 %v749_v0  ;;  %v19_v3 = vld [vmem:[%s1048_s0] sm:$0xff]  ;;  %v20_v4 = vld [vmem:[%s1048_s0 + $0x8] sm:$0xff]  ;;  %v22_v7 = vld [vmem:[%s1048_s0 + $0x18] sm:$0xff]  ;;  %435 = vmatprep.mubr.bf16.mxu1 %v799_v51 }
   0x3   :  { %673 = vmatprep.subr.bf16.mxu0 %v797_v1  ;;  %v45_v5 = vpack.c.bf16 %v20_v4, %v19_v3  ;;  %v751_v8 = vld [vmem:[%s1051_s3 + $0x70] ss:$8 sps:$4 sm:$0xff]   ;;  %v753_v9 = vld [vmem:[%s1051_s3 + $0x74] ss:$8 sps:$4 sm:$0xff]   ;;  %v46_v10 = vpack.c.bf16 %v22_v7, %v21_v6  ;;  %v756_v11 = vld [vmem:[%s1051_s3 + $0x64] ss:$8 sps:$4 sm:$0xff]  }
   0x4   :  { %727 = vmatprep.subr.bf16.mxu1 %v753_v9  ;;  %v754_v12 = vld [vmem:[%s1051_s3 + $0x60] ss:$8 sps:$4 sm:$0xff]   ;;  %v759_v13 = vld [vmem:[%s1051_s3 + $0x54] ss:$8 sps:$4 sm:$0xff]   ;;  %v757_v16 = vld [vmem:[%s1051_s3 + $0x50] ss:$8 sps:$4 sm:$0xff]  }
   0x5   :  { %735 = vmatpush1.bf16.msra.mxu1 %v751_v8  ;;  %v23_v14 = vld [vmem:[%s1048_s0 + $0x20] sm:$0xff]  ;;  %v24_v15 = vld [vmem:[%s1048_s0 + $0x28] sm:$0xff]  ;;  %v765_v20 = vld [vmem:[%s1051_s3 + $0x34] ss:$8 sps:$4 sm:$0xff]  }
   0x6   :  { %674 = vmatpush3.bf16.msra.mxu0 %v750_v2  ;;  %728 = vmatprep.subr.bf16.mxu1 %v756_v11  ;;  %v762_v17 = vld [vmem:[%s1051_s3 + $0x44] ss:$8 sps:$4 sm:$0xff]   ;;  %v47_v18 = vpack.c.bf16 %v24_v15, %v23_v14  ;;  %v760_v19 = vld [vmem:[%s1051_s3 + $0x40] ss:$8 sps:$4 sm:$0xff]   ;;  %v25_v21 = vld [vmem:[%s1048_s0 + $0x30] sm:$0xff] }
   0x7   :  { %393 = vmatprep.subr.bf16.mxu0 %v753_v9  ;;  %v26_v22 = vld [vmem:[%s1048_s0 + $0x38] sm:$0xff]  ;;  %v768_v24 = vld [vmem:[%s1051_s3 + $0x24] ss:$8 sps:$4 sm:$0xff]   ;;  %v766_v26 = vld [vmem:[%s1051_s3 + $0x20] ss:$8 sps:$4 sm:$0xff]  }
   0x8   :  { %v763_v23 = vld [vmem:[%s1051_s3 + $0x30] ss:$8 sps:$4 sm:$0xff]   ;;  %v48_v25 = vpack.c.bf16 %v26_v22, %v25_v21  ;;  %v27_v27 = vld [vmem:[%s1048_s0 + $0x40] sm:$0xff]  ;;  %v28_v28 = vld [vmem:[%s1048_s0 + $0x48] sm:$0xff] }
   0x9   :  { %676 = vmatmul.mubr.msk.bf16.vlgmr.msra.gmra.mxu0 %vm81_vm1, %v45_v5  ;;  %736 = vmatpush1.bf16.msra.mxu1 %v754_v12  ;;  %v49_v29 = vpack.c.bf16 %v28_v28, %v27_v27  ;;  %v29_v30 = vld [vmem:[%s1048_s0 + $0x50] sm:$0xff]  ;;  %v30_v31 = vld [vmem:[%s1048_s0 + $0x58] sm:$0xff]  ;;  %v31_v33 = vld [vmem:[%s1048_s0 + $0x60] sm:$0xff] }
   0xa   :  { %679 = vmatprep.mubr.msk.bf16.mxu0 %vm798_vm0, %v797_v1  ;;  %394 = vmatpush1.bf16.msra.mxu0 %v751_v8  ;;  %v50_v32 = vpack.c.bf16 %v30_v31, %v29_v30  ;;  %v32_v34 = vld [vmem:[%s1048_s0 + $0x68] sm:$0xff]  ;;  %v33_v36 = vld [vmem:[%s1048_s0 + $0x70] sm:$0xff]  ;;  %v34_v37 = vld [vmem:[%s1048_s0 + $0x78] sm:$0xff] }
   0xb   :  { %395 = vmatprep.subr.bf16.mxu0 %v756_v11  ;;  %729 = vmatprep.subr.bf16.mxu1 %v759_v13  ;;  %v51_v35 = vpack.c.bf16 %v32_v34, %v31_v33  ;;  %v52_v38 = vpack.c.bf16 %v34_v37, %v33_v36  ;;  %v35_v39 = vld [vmem:[%s1048_s0 + $0x80] sm:$0xff]  ;;  %v36_v40 = vld [vmem:[%s1048_s0 + $0x88] sm:$0xff]  ;;  %v37_v42 = vld [vmem:[%s1048_s0 + $0x90] sm:$0xff] }
   0xc   :  { %v53_v41 = vpack.c.bf16 %v36_v40, %v35_v39  ;;  %v38_v43 = vld [vmem:[%s1048_s0 + $0x98] sm:$0xff]  ;;  %v774_v47 = vld [vmem:[%s1051_s3 + $0x4] ss:$8 sps:$4 sm:$0xff]   ;;  %v772_v48 = vld [vmem:[%s1051_s3] ss:$8 sps:$4 sm:$0xff]  }
   0xd   :  { %737 = vmatpush1.bf16.msra.mxu1 %v757_v16  ;;  %v771_v44 = vld [vmem:[%s1051_s3 + $0x14] ss:$8 sps:$4 sm:$0xff]   ;;  %v769_v45 = vld [vmem:[%s1051_s3 + $0x10] ss:$8 sps:$4 sm:$0xff]   ;;  %v54_v46 = vpack.c.bf16 %v38_v43, %v37_v42  ;;  %v39_v49 = vld [vmem:[%s1048_s0 + $0xa0] sm:$0xff] }
   0xe   :  { %396 = vmatpush1.bf16.msra.mxu0 %v754_v12  ;;  %730 = vmatprep.subr.bf16.mxu1 %v762_v17  ;;  %v40_v50 = vld [vmem:[%s1048_s0 + $0xa8] sm:$0xff]  ;;  %v41_v53 = vld [vmem:[%s1048_s0 + $0xb0] sm:$0xff]  ;;  %v42_v54 = vld [vmem:[%s1048_s0 + $0xb8] sm:$0xff] }
   0xf   :  { %397 = vmatprep.subr.bf16.mxu0 %v759_v13  ;;  %v55_v52 = vpack.c.bf16 %v40_v50, %v39_v49  ;;  %v56_v55 = vpack.c.bf16 %v42_v54, %v41_v53  ;;  %v43_v56 = vld [vmem:[%s1048_s0 + $0xc0] sm:$0xff]  ;;  %v44_v57 = vld [vmem:[%s1048_s0 + $0xc8] sm:$0xff] }
  0x10   :  { %v57_v58 = vpack.c.bf16 %v44_v57, %v43_v56  ;;  %v1006_v59 = vld [vmem:[%s1050_s2] ss:$0 sm:$0xff] }
  0x11   :  { %680 = vmatmul.mubr.msk.bf16.gmra.mxu0 %vm81_vm1, %v46_v10  ;;  %738 = vmatpush1.bf16.msra.mxu1 %v760_v19 }
  0x12   :  { %683 = vmatprep.mubr.msk.bf16.mxu0 %vm798_vm0, %v797_v1  ;;  %398 = vmatpush1.bf16.msra.mxu0 %v757_v16 }
  0x13   :  { %399 = vmatprep.subr.bf16.mxu0 %v762_v17  ;;  %731 = vmatprep.subr.bf16.mxu1 %v765_v20 }
  0x15   :  { %739 = vmatpush1.bf16.msra.mxu1 %v763_v23 }
  0x16   :  { %400 = vmatpush1.bf16.msra.mxu0 %v760_v19  ;;  %732 = vmatprep.subr.bf16.mxu1 %v768_v24 }
  0x17   :  { %401 = vmatprep.subr.bf16.mxu0 %v765_v20 }
  0x19   :  { %684 = vmatmul.mubr.msk.bf16.gmra.mxu0 %vm81_vm1, %v47_v18  ;;  %740 = vmatpush1.bf16.msra.mxu1 %v766_v26 }
  0x1a   :  { %687 = vmatprep.mubr.msk.bf16.mxu0 %vm798_vm0, %v797_v1  ;;  %402 = vmatpush1.bf16.msra.mxu0 %v763_v23 }
  0x1b   :  { %403 = vmatprep.subr.bf16.mxu0 %v768_v24  ;;  %733 = vmatprep.subr.bf16.mxu1 %v771_v44 }
  0x1d   :  { %741 = vmatpush1.bf16.msra.mxu1 %v769_v45 }
  0x1e   :  { %404 = vmatpush1.bf16.msra.mxu0 %v766_v26  ;;  %734 = vmatprep.subr.bf16.mxu1 %v774_v47 }
  0x1f   :  { %405 = vmatprep.subr.bf16.mxu0 %v771_v44 }
  0x21   :  { %688 = vmatmul.mubr.msk.bf16.gmra.mxu0 %vm81_vm1, %v48_v25  ;;  %742 = vmatpush1.bf16.msra.mxu1 %v772_v48 }
  0x22   :  { %691 = vmatprep.mubr.msk.bf16.mxu0 %vm798_vm0, %v797_v1  ;;  %406 = vmatpush1.bf16.msra.mxu0 %v769_v45 }
  0x23   :  { %407 = vmatprep.subr.bf16.mxu0 %v774_v47 }
  0x26   :  { %408 = vmatpush1.bf16.msra.mxu0 %v772_v48 }
  0x29   :  { %692 = vmatmul.mubr.msk.bf16.gmra.mxu0 %vm81_vm1, %v49_v29 }
  0x2a   :  { %695 = vmatprep.mubr.msk.bf16.mxu0 %vm798_vm0, %v797_v1 }
  0x31   :  { %696 = vmatmul.mubr.msk.bf16.gmra.mxu0 %vm81_vm1, %v50_v32 }
  0x32   :  { %699 = vmatprep.mubr.msk.bf16.mxu0 %vm798_vm0, %v797_v1 }
  0x39   :  { %700 = vmatmul.mubr.msk.bf16.gmra.mxu0 %vm81_vm1, %v51_v35 }
  0x3a   :  { %703 = vmatprep.mubr.msk.bf16.mxu0 %vm798_vm0, %v797_v1 }
  0x41   :  { %704 = vmatmul.mubr.msk.bf16.gmra.mxu0 %vm81_vm1, %v52_v38 }
  0x42   :  { %707 = vmatprep.mubr.msk.bf16.mxu0 %vm798_vm0, %v797_v1 }
  0x49   :  { %708 = vmatmul.mubr.msk.bf16.gmra.mxu0 %vm81_vm1, %v53_v41 }
  0x4a   :  { %711 = vmatprep.mubr.msk.bf16.mxu0 %vm798_vm0, %v797_v1 }
  0x51   :  { %712 = vmatmul.mubr.msk.bf16.gmra.mxu0 %vm81_vm1, %v54_v46 }
  0x52   :  { %715 = vmatprep.mubr.msk.bf16.mxu0 %vm798_vm0, %v797_v1 }
  0x59   :  { %716 = vmatmul.mubr.msk.bf16.gmra.mxu0 %vm81_vm1, %v55_v52 }
  0x5a   :  { %719 = vmatprep.mubr.msk.bf16.mxu0 %vm798_vm0, %v797_v1 }
  0x61   :  { %720 = vmatmul.mubr.msk.bf16.gmra.mxu0 %vm81_vm1, %v56_v55 }
  0x62   :  { %723 = vmatprep.mubr.msk.bf16.mxu0 %vm798_vm0, %v797_v1 }
  0x69   :  { %724 = vmatmul.mubr.msk.bf16.gmra.mxu0 %vm81_vm1, %v57_v58 }
  0x6a   :  { %425 = vmatprep.mubr.bf16.mxu0 %v799_v51 }
  0xc9   :  { %v155_v60 = vpop.f32.mrf.mxu0 }
  0xca   :  { %v156_v62 = vadd.f32 %v1006_v59, %v155_v60 }
  0xcb   :  { %v677_v61 = vpop.f32.mrf.mxu0 }
  0xcc   :  { %v258_v2 = vmax.f32 %v156_v62, 0.0 }
  0xcd   :  { %v158_v63 = vpop.f32.mrf.mxu0 }
  0xce   :  { %v159_v0 = vadd.f32 %v1006_v59, %v158_v63 }
  0xcf   :  { %v678_v1 = vpop.f32.mrf.mxu0 }
  0xd0   :  { %v259_v3 = vmax.f32 %v159_v0, 0.0 }
  0xd1   :  { %v163_v4 = vpop.f32.mrf.mxu0 }
  0xd2   :  { %v284_v5 = vpack.c.bf16 %v259_v3, %v258_v2  ;;  %v164_v7 = vadd.f32 %v1006_v59, %v163_v4 }
  0xd3   :  { %v681_v6 = vpop.f32.mrf.mxu0 }
  0xd4   :  { %426 = vmatmul.mubr.bf16.vlgmr.msra.gmra.mxu0 %v284_v5  ;;  %v260_v11 = vmax.f32 %v164_v7, 0.0 }
  0xd5   :  { %v166_v8 = vpop.f32.mrf.mxu0 }
  0xd6   :  { %v167_v9 = vadd.f32 %v1006_v59, %v166_v8 }
  0xd7   :  { %v682_v10 = vpop.f32.mrf.mxu0 }
  0xd8   :  { %v261_v12 = vmax.f32 %v167_v9, 0.0 }
  0xd9   :  { %v171_v13 = vpop.f32.mrf.mxu0 }
  0xda   :  { %v285_v14 = vpack.c.bf16 %v261_v12, %v260_v11  ;;  %v172_v16 = vadd.f32 %v1006_v59, %v171_v13 }
  0xdb   :  { %v685_v15 = vpop.f32.mrf.mxu0 }
  0xdc   :  { %436 = vmatmul.mubr.bf16.vlgmr.msra.gmra.mxu1 %v285_v14  ;;  %v262_v20 = vmax.f32 %v172_v16, 0.0 }
  0xdd   :  { %v174_v17 = vpop.f32.mrf.mxu0  ;;  %445 = vmatprep.mubr.bf16.mxu1 %v799_v51 }
  0xde   :  { %v175_v18 = vadd.f32 %v1006_v59, %v174_v17 }
  0xdf   :  { %v686_v19 = vpop.f32.mrf.mxu0 }
  0xe0   :  { %v263_v21 = vmax.f32 %v175_v18, 0.0 }
  0xe1   :  { %v179_v22 = vpop.f32.mrf.mxu0 }
  0xe2   :  { %v286_v23 = vpack.c.bf16 %v263_v21, %v262_v20  ;;  %v180_v25 = vadd.f32 %v1006_v59, %v179_v22 }
  0xe3   :  { %v689_v24 = vpop.f32.mrf.mxu0 }
  0xe4   :  { %446 = vmatmul.mubr.bf16.gmra.mxu1 %v286_v23  ;;  %v264_v29 = vmax.f32 %v180_v25, 0.0 }
  0xe5   :  { %v182_v26 = vpop.f32.mrf.mxu0  ;;  %455 = vmatprep.mubr.bf16.mxu1 %v799_v51 }
  0xe6   :  { %v183_v27 = vadd.f32 %v1006_v59, %v182_v26 }
  0xe7   :  { %v690_v28 = vpop.f32.mrf.mxu0 }
  0xe8   :  { %v265_v30 = vmax.f32 %v183_v27, 0.0 }
  0xe9   :  { %v187_v31 = vpop.f32.mrf.mxu0 }
  0xea   :  { %v287_v32 = vpack.c.bf16 %v265_v30, %v264_v29  ;;  %v188_v34 = vadd.f32 %v1006_v59, %v187_v31 }
  0xeb   :  { %v693_v33 = vpop.f32.mrf.mxu0 }
  0xec   :  { %456 = vmatmul.mubr.bf16.gmra.mxu1 %v287_v32  ;;  %v266_v38 = vmax.f32 %v188_v34, 0.0 }
  0xed   :  { %v190_v35 = vpop.f32.mrf.mxu0  ;;  %465 = vmatprep.mubr.bf16.mxu1 %v799_v51 }
  0xee   :  { %v191_v36 = vadd.f32 %v1006_v59, %v190_v35 }
  0xef   :  { %v694_v37 = vpop.f32.mrf.mxu0 }
  0xf0   :  { %v267_v39 = vmax.f32 %v191_v36, 0.0 }
  0xf1   :  { %v195_v40 = vpop.f32.mrf.mxu0 }
  0xf2   :  { %v288_v41 = vpack.c.bf16 %v267_v39, %v266_v38  ;;  %v196_v43 = vadd.f32 %v1006_v59, %v195_v40 }
  0xf3   :  { %v697_v42 = vpop.f32.mrf.mxu0 }
  0xf4   :  { %466 = vmatmul.mubr.bf16.gmra.mxu1 %v288_v41  ;;  %v268_v47 = vmax.f32 %v196_v43, 0.0 }
  0xf5   :  { %v198_v44 = vpop.f32.mrf.mxu0  ;;  %475 = vmatprep.mubr.bf16.mxu1 %v799_v51 }
  0xf6   :  { %v199_v45 = vadd.f32 %v1006_v59, %v198_v44 }
  0xf7   :  { %v698_v46 = vpop.f32.mrf.mxu0 }
  0xf8   :  { %v269_v48 = vmax.f32 %v199_v45, 0.0 }
  0xf9   :  { %v203_v49 = vpop.f32.mrf.mxu0 }
  0xfa   :  { %v289_v50 = vpack.c.bf16 %v269_v48, %v268_v47  ;;  %v204_v53 = vadd.f32 %v1006_v59, %v203_v49 }
  0xfb   :  { %v701_v52 = vpop.f32.mrf.mxu0 }
  0xfc   :  { %476 = vmatmul.mubr.bf16.gmra.mxu1 %v289_v50  ;;  %v270_v57 = vmax.f32 %v204_v53, 0.0 }
  0xfd   :  { %v206_v54 = vpop.f32.mrf.mxu0  ;;  %485 = vmatprep.mubr.bf16.mxu1 %v799_v51 }
  0xfe   :  { %v207_v55 = vadd.f32 %v1006_v59, %v206_v54 }
  0xff   :  { %v702_v56 = vpop.f32.mrf.mxu0 }
 0x100   :  { %v271_v58 = vmax.f32 %v207_v55, 0.0 }
 0x101   :  { %v211_v60 = vpop.f32.mrf.mxu0 }
 0x102   :  { %v290_v61 = vpack.c.bf16 %v271_v58, %v270_v57  ;;  %v212_v63 = vadd.f32 %v1006_v59, %v211_v60 }
 0x103   :  { %v705_v62 = vpop.f32.mrf.mxu0 }
 0x104   :  { %486 = vmatmul.mubr.bf16.gmra.mxu1 %v290_v61  ;;  %v272_v3 = vmax.f32 %v212_v63, 0.0 }
 0x105   :  { %v214_v0 = vpop.f32.mrf.mxu0  ;;  %495 = vmatprep.mubr.bf16.mxu1 %v799_v51 }
 0x106   :  { %v215_v1 = vadd.f32 %v1006_v59, %v214_v0 }
 0x107   :  { %v706_v2 = vpop.f32.mrf.mxu0 }
 0x108   :  { %v273_v4 = vmax.f32 %v215_v1, 0.0 }
 0x109   :  { %v219_v5 = vpop.f32.mrf.mxu0 }
 0x10a   :  { %v291_v6 = vpack.c.bf16 %v273_v4, %v272_v3  ;;  %v220_v8 = vadd.f32 %v1006_v59, %v219_v5 }
 0x10b   :  { %v709_v7 = vpop.f32.mrf.mxu0 }
 0x10c   :  { %496 = vmatmul.mubr.bf16.gmra.mxu1 %v291_v6  ;;  %v274_v12 = vmax.f32 %v220_v8, 0.0 }
 0x10d   :  { %v222_v9 = vpop.f32.mrf.mxu0  ;;  %505 = vmatprep.mubr.bf16.mxu1 %v799_v51 }
 0x10e   :  { %v223_v10 = vadd.f32 %v1006_v59, %v222_v9 }
 0x10f   :  { %v710_v11 = vpop.f32.mrf.mxu0 }
 0x110   :  { %v275_v13 = vmax.f32 %v223_v10, 0.0 }
 0x111   :  { %v227_v14 = vpop.f32.mrf.mxu0 }
 0x112   :  { %v292_v15 = vpack.c.bf16 %v275_v13, %v274_v12  ;;  %v228_v17 = vadd.f32 %v1006_v59, %v227_v14 }
 0x113   :  { %v713_v16 = vpop.f32.mrf.mxu0 }
 0x114   :  { %506 = vmatmul.mubr.bf16.gmra.mxu1 %v292_v15  ;;  %v276_v21 = vmax.f32 %v228_v17, 0.0 }
 0x115   :  { %v230_v18 = vpop.f32.mrf.mxu0  ;;  %515 = vmatprep.mubr.bf16.mxu1 %v799_v51 }
 0x116   :  { %v231_v19 = vadd.f32 %v1006_v59, %v230_v18 }
 0x117   :  { %v714_v20 = vpop.f32.mrf.mxu0 }
 0x118   :  { %v277_v22 = vmax.f32 %v231_v19, 0.0 }
 0x119   :  { %v235_v23 = vpop.f32.mrf.mxu0 }
 0x11a   :  { %v293_v24 = vpack.c.bf16 %v277_v22, %v276_v21  ;;  %v236_v26 = vadd.f32 %v1006_v59, %v235_v23 }
 0x11b   :  { %v717_v25 = vpop.f32.mrf.mxu0 }
 0x11c   :  { %516 = vmatmul.mubr.bf16.gmra.mxu1 %v293_v24  ;;  %v278_v30 = vmax.f32 %v236_v26, 0.0 }
 0x11d   :  { %v238_v27 = vpop.f32.mrf.mxu0  ;;  %525 = vmatprep.mubr.bf16.mxu1 %v799_v51 }
 0x11e   :  { %v239_v28 = vadd.f32 %v1006_v59, %v238_v27 }
 0x11f   :  { %v718_v29 = vpop.f32.mrf.mxu0 }
 0x120   :  { %v279_v31 = vmax.f32 %v239_v28, 0.0 }
 0x121   :  { %v243_v32 = vpop.f32.mrf.mxu0 }
 0x122   :  { %v294_v33 = vpack.c.bf16 %v279_v31, %v278_v30  ;;  %v244_v35 = vadd.f32 %v1006_v59, %v243_v32 }
 0x123   :  { %v721_v34 = vpop.f32.mrf.mxu0 }
 0x124   :  { %526 = vmatmul.mubr.bf16.gmra.mxu1 %v294_v33  ;;  %v280_v39 = vmax.f32 %v244_v35, 0.0 }
 0x125   :  { %v246_v36 = vpop.f32.mrf.mxu0  ;;  %535 = vmatprep.mubr.bf16.mxu1 %v799_v51 }
 0x126   :  { %v247_v37 = vadd.f32 %v1006_v59, %v246_v36 }
 0x127   :  { %v722_v38 = vpop.f32.mrf.mxu0 }
 0x128   :  { %v281_v40 = vmax.f32 %v247_v37, 0.0 }
 0x129   :  { %v251_v41 = vpop.f32.mrf.mxu0 }
 0x12a   :  { %v295_v42 = vpack.c.bf16 %v281_v40, %v280_v39  ;;  %v252_v44 = vadd.f32 %v1006_v59, %v251_v41 }
 0x12b   :  { %v725_v43 = vpop.f32.mrf.mxu0 }
 0x12c   :  { %536 = vmatmul.mubr.bf16.gmra.mxu1 %v295_v42  ;;  %v282_v48 = vmax.f32 %v252_v44, 0.0 }
 0x12d   :  { %v254_v45 = vpop.f32.mrf.mxu0  ;;  %545 = vmatprep.mubr.bf16.mxu1 %v799_v51 }
 0x12e   :  { %v255_v46 = vadd.f32 %v1006_v59, %v254_v45 }
 0x12f   :  { %v726_v47 = vpop.f32.mrf.mxu0 }
 0x130   :  { %v283_v49 = vmax.f32 %v255_v46, 0.0 }
 0x132   :  { %v296_v50 = vpack.c.bf16 %v283_v49, %v282_v48 }
 0x134   :  { %546 = vmatmul.mubr.bf16.gmra.mxu1 %v296_v50 }
 0x194   :  { %v427_v52 = vpop.f32.mrf.mxu0 }
 0x195   :  { %556 = vst [vmem:[#allocation2] sm:$0xff] %v427_v52 }
 0x196   :  { %v429_v53 = vpop.f32.mrf.mxu0 }
 0x197   :  { %557 = vst [vmem:[#allocation2 + $0x8] sm:$0xff] %v429_v53 }
 0x198   :  { %v431_v54 = vpop.f32.mrf.mxu0 }
 0x199   :  { %558 = vst [vmem:[#allocation2 + $0x10] sm:$0xff] %v431_v54 }
 0x19a   :  { %v433_v55 = vpop.f32.mrf.mxu0 }
 0x19b   :  { %559 = vst [vmem:[#allocation2 + $0x18] sm:$0xff] %v433_v55 }
 0x19c   :  { %v437_v56 = vpop.f32.mrf.mxu1 }
 0x19d   :  { %560 = vst [vmem:[#allocation2 + $0x20] sm:$0xff] %v437_v56 }
 0x19e   :  { %v439_v57 = vpop.f32.mrf.mxu1 }
 0x19f   :  { %561 = vst [vmem:[#allocation2 + $0x28] sm:$0xff] %v439_v57 }
 0x1a0   :  { %v441_v51 = vpop.f32.mrf.mxu1 }
 0x1a1   :  { %562 = vst [vmem:[#allocation2 + $0x30] sm:$0xff] %v441_v51 }
 0x1a2   :  { %v443_v59 = vpop.f32.mrf.mxu1 }
 0x1a3   :  { %563 = vst [vmem:[#allocation2 + $0x38] sm:$0xff] %v443_v59 }
 0x1a4   :  { %v447_v58 = vpop.f32.mrf.mxu1 }
 0x1a5   :  { %564 = vst [vmem:[#allocation2 + $0x40] sm:$0xff] %v447_v58 }
 0x1a6   :  { %v449_v60 = vpop.f32.mrf.mxu1 }
 0x1a7   :  { %565 = vst [vmem:[#allocation2 + $0x48] sm:$0xff] %v449_v60 }
 0x1a8   :  { %v451_v61 = vpop.f32.mrf.mxu1 }
 0x1a9   :  { %566 = vst [vmem:[#allocation2 + $0x50] sm:$0xff] %v451_v61 }
 0x1aa   :  { %v453_v62 = vpop.f32.mrf.mxu1 }
 0x1ab   :  { %567 = vst [vmem:[#allocation2 + $0x58] sm:$0xff] %v453_v62 }
 0x1ac   :  { %v457_v63 = vpop.f32.mrf.mxu1 }
 0x1ad   :  { %568 = vst [vmem:[#allocation2 + $0x60] sm:$0xff] %v457_v63 }
 0x1ae   :  { %v459_v0 = vpop.f32.mrf.mxu1 }
 0x1af   :  { %569 = vst [vmem:[#allocation2 + $0x68] sm:$0xff] %v459_v0 }
 0x1b0   :  { %v461_v1 = vpop.f32.mrf.mxu1 }
 0x1b1   :  { %570 = vst [vmem:[#allocation2 + $0x70] sm:$0xff] %v461_v1 }
 0x1b2   :  { %v463_v2 = vpop.f32.mrf.mxu1 }
 0x1b3   :  { %571 = vst [vmem:[#allocation2 + $0x78] sm:$0xff] %v463_v2 }
 0x1b4   :  { %v467_v3 = vpop.f32.mrf.mxu1 }
 0x1b5   :  { %572 = vst [vmem:[#allocation2 + $0x80] sm:$0xff] %v467_v3 }
 0x1b6   :  { %v469_v4 = vpop.f32.mrf.mxu1 }
 0x1b7   :  { %573 = vst [vmem:[#allocation2 + $0x88] sm:$0xff] %v469_v4 }
 0x1b8   :  { %v471_v5 = vpop.f32.mrf.mxu1 }
 0x1b9   :  { %574 = vst [vmem:[#allocation2 + $0x90] sm:$0xff] %v471_v5 }
 0x1ba   :  { %v473_v6 = vpop.f32.mrf.mxu1 }
 0x1bb   :  { %575 = vst [vmem:[#allocation2 + $0x98] sm:$0xff] %v473_v6 }
 0x1bc   :  { %v477_v7 = vpop.f32.mrf.mxu1 }
 0x1bd   :  { %576 = vst [vmem:[#allocation2 + $0xa0] sm:$0xff] %v477_v7 }
 0x1be   :  { %v479_v8 = vpop.f32.mrf.mxu1 }
 0x1bf   :  { %577 = vst [vmem:[#allocation2 + $0xa8] sm:$0xff] %v479_v8 }
 0x1c0   :  { %v481_v9 = vpop.f32.mrf.mxu1 }
 0x1c1   :  { %578 = vst [vmem:[#allocation2 + $0xb0] sm:$0xff] %v481_v9 }
 0x1c2   :  { %v483_v10 = vpop.f32.mrf.mxu1 }
 0x1c3   :  { %579 = vst [vmem:[#allocation2 + $0xb8] sm:$0xff] %v483_v10 }
 0x1c4   :  { %v487_v11 = vpop.f32.mrf.mxu1 }
 0x1c5   :  { %580 = vst [vmem:[#allocation2 + $0xc0] sm:$0xff] %v487_v11 }
 0x1c6   :  { %v489_v12 = vpop.f32.mrf.mxu1 }
 0x1c7   :  { %581 = vst [vmem:[#allocation2 + $0xc8] sm:$0xff] %v489_v12 }
 0x1c8   :  { %v491_v13 = vpop.f32.mrf.mxu1 }
 0x1c9   :  { %582 = vst [vmem:[#allocation2 + $0xd0] sm:$0xff] %v491_v13 }
 0x1ca   :  { %v493_v14 = vpop.f32.mrf.mxu1 }
 0x1cb   :  { %583 = vst [vmem:[#allocation2 + $0xd8] sm:$0xff] %v493_v14 }
 0x1cc   :  { %v497_v15 = vpop.f32.mrf.mxu1 }
 0x1cd   :  { %584 = vst [vmem:[#allocation2 + $0xe0] sm:$0xff] %v497_v15 }
 0x1ce   :  { %v499_v16 = vpop.f32.mrf.mxu1 }
 0x1cf   :  { %585 = vst [vmem:[#allocation2 + $0xe8] sm:$0xff] %v499_v16 }
 0x1d0   :  { %v501_v17 = vpop.f32.mrf.mxu1 }
 0x1d1   :  { %586 = vst [vmem:[#allocation2 + $0xf0] sm:$0xff] %v501_v17 }
 0x1d2   :  { %v503_v18 = vpop.f32.mrf.mxu1 }
 0x1d3   :  { %587 = vst [vmem:[#allocation2 + $0xf8] sm:$0xff] %v503_v18 }
 0x1d4   :  { %v507_v19 = vpop.f32.mrf.mxu1 }
 0x1d5   :  { %588 = vst [vmem:[#allocation2 + $0x100] sm:$0xff] %v507_v19 }
 0x1d6   :  { %v509_v20 = vpop.f32.mrf.mxu1 }
 0x1d7   :  { %589 = vst [vmem:[#allocation2 + $0x108] sm:$0xff] %v509_v20 }
 0x1d8   :  { %v511_v21 = vpop.f32.mrf.mxu1 }
 0x1d9   :  { %590 = vst [vmem:[#allocation2 + $0x110] sm:$0xff] %v511_v21 }
 0x1da   :  { %v513_v22 = vpop.f32.mrf.mxu1 }
 0x1db   :  { %591 = vst [vmem:[#allocation2 + $0x118] sm:$0xff] %v513_v22 }
 0x1dc   :  { %v517_v23 = vpop.f32.mrf.mxu1 }
 0x1dd   :  { %592 = vst [vmem:[#allocation2 + $0x120] sm:$0xff] %v517_v23 }
 0x1de   :  { %v519_v24 = vpop.f32.mrf.mxu1 }
 0x1df   :  { %593 = vst [vmem:[#allocation2 + $0x128] sm:$0xff] %v519_v24 }
 0x1e0   :  { %v521_v25 = vpop.f32.mrf.mxu1 }
 0x1e1   :  { %594 = vst [vmem:[#allocation2 + $0x130] sm:$0xff] %v521_v25 }
 0x1e2   :  { %v523_v26 = vpop.f32.mrf.mxu1 }
 0x1e3   :  { %595 = vst [vmem:[#allocation2 + $0x138] sm:$0xff] %v523_v26 }
 0x1e4   :  { %v527_v27 = vpop.f32.mrf.mxu1 }
 0x1e5   :  { %596 = vst [vmem:[#allocation2 + $0x140] sm:$0xff] %v527_v27 }
 0x1e6   :  { %v529_v28 = vpop.f32.mrf.mxu1 }
 0x1e7   :  { %597 = vst [vmem:[#allocation2 + $0x148] sm:$0xff] %v529_v28 }
 0x1e8   :  { %v531_v29 = vpop.f32.mrf.mxu1 }
 0x1e9   :  { %598 = vst [vmem:[#allocation2 + $0x150] sm:$0xff] %v531_v29 }
 0x1ea   :  { %v533_v30 = vpop.f32.mrf.mxu1 }
 0x1eb   :  { %599 = vst [vmem:[#allocation2 + $0x158] sm:$0xff] %v533_v30 }
 0x1ec   :  { %v537_v31 = vpop.f32.mrf.mxu1 }
 0x1ed   :  { %600 = vst [vmem:[#allocation2 + $0x160] sm:$0xff] %v537_v31 }
 0x1ee   :  { %v539_v32 = vpop.f32.mrf.mxu1 }
 0x1ef   :  { %601 = vst [vmem:[#allocation2 + $0x168] sm:$0xff] %v539_v32 }
 0x1f0   :  { %v541_v33 = vpop.f32.mrf.mxu1 }
 0x1f1   :  { %602 = vst [vmem:[#allocation2 + $0x170] sm:$0xff] %v541_v33 }
 0x1f2   :  { %v543_v34 = vpop.f32.mrf.mxu1 }
 0x1f3   :  { %603 = vst [vmem:[#allocation2 + $0x178] sm:$0xff] %v543_v34 }
 0x1f4   :  { %v547_v35 = vpop.f32.mrf.mxu1 }
 0x1f5   :  { %604 = vst [vmem:[#allocation2 + $0x180] sm:$0xff] %v547_v35 }
 0x1f6   :  { %v549_v36 = vpop.f32.mrf.mxu1 }
 0x1f7   :  { %605 = vst [vmem:[#allocation2 + $0x188] sm:$0xff] %v549_v36 }
 0x1f8   :  { %v551_v37 = vpop.f32.mrf.mxu1 }
 0x1f9   :  { %606 = vst [vmem:[#allocation2 + $0x190] sm:$0xff] %v551_v37 }
 0x1fa   :  { %v553_v38 = vpop.f32.mrf.mxu1 }
 0x1fb   :  { %607 = vst [vmem:[#allocation2 + $0x198] sm:$0xff] %v553_v38 }
 0x1fc   :  { %612 = vsyncadd [#allocation3], 256  ;;  %s800_s0 = smov [#allocation2]  }
 0x1fd   :  { %s613_s2 = sshll.u32 %s800_s0, 4  ;;  %s614_s2 = int_to_ptr.vmem [resolvable:$true] %s613_s2 }
 0x1fe   :  { %s775_s1 = scalar_lea.vmem %s614_s2, 6400  ;;  %s779_s23 = scalar_lea.vmem %s614_s2, 6656 }
 0x1ff   :  { %p776_p0 = scmp.ne.s32.totalorder %s614_s2, %s775_s1  ;;  %p780_p1 = scmp.lt.s32.totalorder %s614_s2, %s614_s2 }
 0x200   :  { %p781_p2 = scmp.lt.s32.totalorder %s779_s23, %s775_s1 }
 0x202   :  { %p782_p3 = por %p781_p2, %p780_p1 }
 0x204   :  { %p783_p4 = pnand %p782_p3, %p776_p0 }
 0x206   :  { %786 = shalt.err (!%p783_p4)
}
 0x207   :  { %s801_s24 = smov 256   ;;  %s802_s25 = smov 16  }
 0x208   :  { %619 = dma.vmem_to_hbm [thread:$0]  %s614_s2, 6400, %s1052_s4, [#allocation3], %s801_s24, %s801_s24, %s802_s25  }
 0x209   :  { %795 = dma.done.wait [#allocation3], 6656  }
 0x20a   :  { %796 = vsyncadd [#allocation3], 4294960640 }
 0x20b   :  { %623 = vsyncpa [#allocation3], 1 }

</bundles_post_ra>
